<compile_context>
chip_gen: v7x
topology: tpu7x:2x2x1
jax: 0.10.0
libtpu: 0.0.40
codegen_flags: <defaults>
</compile_context>

<pallas_src>
import functools

import jax
import jax.numpy as jnp
from jax.experimental import pallas as pl
from jax.experimental.pallas import tpu as pltpu


_LANE = 128  # TPU vreg lane width; head output is padded to a multiple of this.


# ----------------------------- Fused Pallas kernel -------------------------- #

def _make_fused_actor_kernel(n_layers):
    """Build a fused kernel for `n_layers` (matmul, bias) pairs.

    Layers 0 .. n_layers-2 : Linear -> ReLU   (BN already folded into W/b)
    Layer  n_layers-1      : Linear -> Tanh   (output head, lane-padded)
    """
    def kernel(x_ref, *refs):
        o_ref = refs[-1]
        p = refs[:-1]                      # [w0_t, b0, w1_t, b1, ..., wh_t, bh]
        x = x_ref[...]
        for i in range(n_layers - 1):
            w = p[2 * i][...]
            b = p[2 * i + 1][...]
            x = jnp.maximum(
                jnp.dot(x, w, preferred_element_type=jnp.float32) + b, 0.0)
        wh = p[2 * (n_layers - 1)][...]
        bh = p[2 * (n_layers - 1) + 1][...]
        o_ref[...] = jnp.tanh(
            jnp.dot(x, wh, preferred_element_type=jnp.float32) + bh)
    return kernel


@functools.partial(jax.jit, static_argnames=("action_dim", "batch_tile"))
def actor_forward(state, flat_params, action_dim, batch_tile=2048):
    """Single fused pallas_call for the whole Actor forward pass.

    state       : (B, state_dim) float32
    flat_params : [w0_t, b0, w1_t, b1, ..., wh_t, bh]
                  wi_t : (din_i, dout_i), bi : (1, dout_i)  -- BN pre-folded,
                  head padded to a 128-lane-dense output.
    Returns     : (B, action_dim) float32
    """
    B, Din = state.shape
    n_layers = len(flat_params) // 2
    out_pad = flat_params[-1].shape[-1]    # lane-padded head width (mult of 128)

    # --- Batch tile selection ------------------------------------------------
    # * at least 8 rows (sublane granularity), at most `batch_tile`
    # * force >= 2 grid steps whenever B > 8 so dimension_semantics="parallel"
    #   can shard the batch axis across both TensorCores on v7x.
    if B <= 8:
        TB = 8
    else:
        half = max(8, (B // 2) // 8 * 8)
        TB = min(batch_tile, half)
    grid_n = pl.cdiv(B, TB)
    B_pad = grid_n * TB
    if B_pad != B:
        state = jnp.pad(state, ((0, B_pad - B), (0, 0)))

    in_specs = [pl.BlockSpec((TB, Din), lambda i: (i, 0))]
    for arr in flat_params:
        # Weights / biases are tiny and grid-invariant: full array, block (0,0)
        # every step -> stays resident, no per-step DMA.
        in_specs.append(pl.BlockSpec(arr.shape, lambda i: (0, 0)))
    out_spec = pl.BlockSpec((TB, out_pad), lambda i: (i, 0))

    out = pl.pallas_call(
        _make_fused_actor_kernel(n_layers),
        out_shape=jax.ShapeDtypeStruct((B_pad, out_pad), jnp.float32),
        grid=(grid_n,),
        in_specs=in_specs,
        out_specs=out_spec,
        compiler_params=pltpu.CompilerParams(
            dimension_semantics=("parallel",)),
    )(state, *flat_params)

    return out[:B, :action_dim]


# ---------------------------- Parameter creation ---------------------------- #

def init_actor_params(key, state_dim, action_dim, hidden_dims, eps=1e-5):
    """Deterministic synthetic parameters matching the PyTorch module's shapes
    (raw, un-folded form: per hidden layer W,b + eval-mode BN scale/shift).
    BatchNorm running stats / affine params are NON-trivial so the BN-fold
    path is genuinely exercised by the self-test."""
    raw_hidden = []
    dims = [state_dim] + list(hidden_dims)
    for i in range(len(hidden_dims)):
        din, dout = dims[i], dims[i + 1]
        key, kw, kb, kg, kbe, km, kv = jax.random.split(key, 7)
        bound = 1.0 / jnp.sqrt(din)
        w = jax.random.uniform(kw, (dout, din), jnp.float32, -bound, bound)
        b = jax.random.uniform(kb, (dout,), jnp.float32, -bound, bound)
        # BatchNorm1d eval-mode affine from (non-trivial) running stats.
        gamma = jax.random.uniform(kg, (dout,), jnp.float32, 0.5, 1.5)
        beta = jax.random.uniform(kbe, (dout,), jnp.float32, -0.5, 0.5)
        r_mean = 0.2 * jax.random.normal(km, (dout,), jnp.float32)
        r_var = jax.random.uniform(kv, (dout,), jnp.float32, 0.5, 2.0)
        inv_std = gamma / jnp.sqrt(r_var + eps)
        scale = inv_std
        shift = beta - r_mean * inv_std
        raw_hidden.append(dict(w=w, b=b, scale=scale, shift=shift))
    din, dout = dims[-1], action_dim
    key, kw, kb = jax.random.split(key, 3)
    bound = 1.0 / jnp.sqrt(din)
    w = jax.random.uniform(kw, (dout, din), jnp.float32, -bound, bound)
    b = jax.random.uniform(kb, (dout,), jnp.float32, -bound, bound)
    raw_head = dict(w=w, b=b)
    return raw_hidden, raw_head


def fold_bn_params(raw_hidden, raw_head):
    """Fold each eval-mode BN affine (which sits AFTER its ReLU) into the NEXT
    linear layer.  Exact, since the fold happens after the nonlinearity:
        Wt'_{next} = diag(scale) @ Wt_{next},  b'_{next} = b_{next} + shift @ Wt_{next}
    The final head is zero-padded along its output axis to a multiple of 128 so
    the kernel's output block is lane-dense (tanh(0)=0 in the pad columns).
    Returns a flat list [w0_t, b0, w1_t, b1, ..., wh_t, bh]."""
    flat = []
    wt = raw_hidden[0]["w"].T                       # (din, dout0)
    b = raw_hidden[0]["b"]
    for i in range(len(raw_hidden)):
        flat.append(wt.astype(jnp.float32))
        flat.append(b.reshape(1, -1).astype(jnp.float32))
        scale = raw_hidden[i]["scale"]
        shift = raw_hidden[i]["shift"]
        if i + 1 < len(raw_hidden):
            w_next, b_next = raw_hidden[i + 1]["w"], raw_hidden[i + 1]["b"]
        else:
            w_next, b_next = raw_head["w"], raw_head["b"]
        wt = scale[:, None] * w_next.T              # (dout_i, dout_{i+1})
        b = b_next + shift @ w_next.T
    # Lane-pad the folded head so the kernel output is 128-lane dense.
    dout = wt.shape[1]
    pad = (-dout) % _LANE
    if pad:
        wt = jnp.pad(wt, ((0, 0), (0, pad)))
        b = jnp.pad(b, ((0, pad),))
    flat.append(wt.astype(jnp.float32))
    flat.append(b.reshape(1, -1).astype(jnp.float32))
    return flat


# ------------------------------- Reference ---------------------------------- #

def actor_forward_ref(state, raw_hidden, raw_head):
    """Pure-JAX reference using the RAW (un-folded) parameters."""
    # TODO(synk): Dropout(0.1) is identity in eval mode; train-mode dropout and
    # BN batch statistics are intentionally not modelled.
    x = state
    for p in raw_hidden:
        x = jnp.maximum(x @ p["w"].T + p["b"], 0.0) * p["scale"] + p["shift"]
    return jnp.tanh(x @ raw_head["w"].T + raw_head["b"])


# ----------------------------------- Main ----------------------------------- #

if __name__ == "__main__":
    state_dim = 16
    action_dim = 8
    hidden_dims = [32, 32]

    key = jax.random.PRNGKey(0)
    key, k_params = jax.random.split(key)
    raw_hidden, raw_head = init_actor_params(
        k_params, state_dim, action_dim, hidden_dims)
    flat_params = fold_bn_params(raw_hidden, raw_head)

    ok = True
    # Two batch sizes: tiny (single-tile path) and a ragged one that exercises
    # batch padding + a multi-step grid (v7x dual-TC sharding path).
    for batch in (8, 20):
        key, k_state = jax.random.split(key)
        state = jax.random.normal(k_state, (batch, state_dim), jnp.float32)

        out = actor_forward(state, flat_params, action_dim)
        out = jax.block_until_ready(out)

        ref = actor_forward_ref(state, raw_hidden, raw_head)
        assert out.shape == (batch, action_dim)
        ok = ok and bool(jnp.allclose(out, ref, atol=1e-4, rtol=1e-4))

    assert ok, "mismatch vs reference"
    print("KERNEL_OK")
</pallas_src>

<mosaic_0001>
module attributes {stable_mosaic.version = 11 : i64} {
  func.func @kernel(%arg0: i32, %arg1: memref<8x16xf32, #tpu.memory_space<vmem>>, %arg2: memref<16x32xf32, #tpu.memory_space<vmem>>, %arg3: memref<1x32xf32, #tpu.memory_space<vmem>>, %arg4: memref<32x32xf32, #tpu.memory_space<vmem>>, %arg5: memref<1x32xf32, #tpu.memory_space<vmem>>, %arg6: memref<32x128xf32, #tpu.memory_space<vmem>>, %arg7: memref<1x128xf32, #tpu.memory_space<vmem>>, %arg8: memref<8x128xf32, #tpu.memory_space<vmem>>) attributes {dimension_semantics = [#tpu.dimension_semantics<parallel>], iteration_bounds = array<i64: 1>, scalar_prefetch = 0 : i64, scratch_operands = 0 : i64, tpu.core_type = #tpu.core_type<tc>, window_params = [{transform_indices = @transform_0, window_bounds = array<i64: 8, 16>}, {pipeline_mode = #tpu.pipeline_mode<synchronous>, transform_indices = @transform_1, window_bounds = array<i64: 16, 32>}, {pipeline_mode = #tpu.pipeline_mode<synchronous>, transform_indices = @transform_2, window_bounds = array<i64: 1, 32>}, {pipeline_mode = #tpu.pipeline_mode<synchronous>, transform_indices = @transform_3, window_bounds = array<i64: 32, 32>}, {pipeline_mode = #tpu.pipeline_mode<synchronous>, transform_indices = @transform_4, window_bounds = array<i64: 1, 32>}, {pipeline_mode = #tpu.pipeline_mode<synchronous>, transform_indices = @transform_5, window_bounds = array<i64: 32, 128>}, {pipeline_mode = #tpu.pipeline_mode<synchronous>, transform_indices = @transform_6, window_bounds = array<i64: 1, 128>}, {transform_indices = @transform_7, window_bounds = array<i64: 8, 128>}]} {
    %c0 = arith.constant 0 : index
    %c0_0 = arith.constant 0 : index
    %0 = vector.load %arg1[%c0, %c0_0] : memref<8x16xf32, #tpu.memory_space<vmem>>, vector<8x16xf32>
    %c0_1 = arith.constant 0 : index
    %c0_2 = arith.constant 0 : index
    %1 = vector.load %arg2[%c0_1, %c0_2] : memref<16x32xf32, #tpu.memory_space<vmem>>, vector<16x32xf32>
    %c0_3 = arith.constant 0 : index
    %c0_4 = arith.constant 0 : index
    %2 = vector.load %arg3[%c0_3, %c0_4] : memref<1x32xf32, #tpu.memory_space<vmem>>, vector<1x32xf32>
    %cst = arith.constant dense<0.000000e+00> : vector<8x32xf32>
    %3 = tpu.matmul %0, %1, %cst {dimension_numbers = #tpu.dot_dimension_numbers<[1], [0], [0], [1], [0, 0, 1, 1], [], []>} : vector<8x16xf32>, vector<16x32xf32>, vector<8x32xf32> -> vector<8x32xf32>
    %4 = vector.broadcast %2 : vector<1x32xf32> to vector<8x32xf32>
    %5 = arith.addf %3, %4 : vector<8x32xf32>
    %cst_5 = arith.constant 0.000000e+00 : f32
    %6 = vector.broadcast %cst_5 : f32 to vector<8x32xf32>
    %7 = arith.maximumf %5, %6 : vector<8x32xf32>
    %c0_6 = arith.constant 0 : index
    %c0_7 = arith.constant 0 : index
    %8 = vector.load %arg4[%c0_6, %c0_7] : memref<32x32xf32, #tpu.memory_space<vmem>>, vector<32x32xf32>
    %c0_8 = arith.constant 0 : index
    %c0_9 = arith.constant 0 : index
    %9 = vector.load %arg5[%c0_8, %c0_9] : memref<1x32xf32, #tpu.memory_space<vmem>>, vector<1x32xf32>
    %cst_10 = arith.constant dense<0.000000e+00> : vector<8x32xf32>
    %10 = tpu.matmul %7, %8, %cst_10 {dimension_numbers = #tpu.dot_dimension_numbers<[1], [0], [0], [1], [0, 0, 1, 1], [], []>} : vector<8x32xf32>, vector<32x32xf32>, vector<8x32xf32> -> vector<8x32xf32>
    %11 = vector.broadcast %9 : vector<1x32xf32> to vector<8x32xf32>
    %12 = arith.addf %10, %11 : vector<8x32xf32>
    %cst_11 = arith.constant 0.000000e+00 : f32
    %13 = vector.broadcast %cst_11 : f32 to vector<8x32xf32>
    %14 = arith.maximumf %12, %13 : vector<8x32xf32>
    %c0_12 = arith.constant 0 : index
    %c0_13 = arith.constant 0 : index
    %15 = vector.load %arg6[%c0_12, %c0_13] : memref<32x128xf32, #tpu.memory_space<vmem>>, vector<32x128xf32>
    %c0_14 = arith.constant 0 : index
    %c0_15 = arith.constant 0 : index
    %16 = vector.load %arg7[%c0_14, %c0_15] : memref<1x128xf32, #tpu.memory_space<vmem>>, vector<1x128xf32>
    %cst_16 = arith.constant dense<0.000000e+00> : vector<8x128xf32>
    %17 = tpu.matmul %14, %15, %cst_16 {dimension_numbers = #tpu.dot_dimension_numbers<[1], [0], [0], [1], [0, 0, 1, 1], [], []>} : vector<8x32xf32>, vector<32x128xf32>, vector<8x128xf32> -> vector<8x128xf32>
    %18 = vector.broadcast %16 : vector<1x128xf32> to vector<8x128xf32>
    %19 = arith.addf %17, %18 : vector<8x128xf32>
    %20 = math.tanh %19 : vector<8x128xf32>
    %c0_17 = arith.constant 0 : index
    %c0_18 = arith.constant 0 : index
    %21 = vector.load %arg8[%c0_17, %c0_18] : memref<8x128xf32, #tpu.memory_space<vmem>>, vector<8x128xf32>
    tpu.vector_store %arg8[%c0_17, %c0_18], %20 {strides = array<i32>} : memref<8x128xf32, #tpu.memory_space<vmem>>, vector<8x128xf32>,
    return
  }
  func.func @transform_0(%arg0: i32) -> (i32, i32) {
    %c0_i32 = arith.constant 0 : i32
    %c0_i32_0 = arith.constant 0 : i32
    return %arg0, %c0_i32 : i32, i32
  }
  func.func @transform_1(%arg0: i32) -> (i32, i32) {
    %c0_i32 = arith.constant 0 : i32
    %c0_i32_0 = arith.constant 0 : i32
    %c0_i32_1 = arith.constant 0 : i32
    return %c0_i32, %c0_i32_0 : i32, i32
  }
  func.func @transform_2(%arg0: i32) -> (i32, i32) {
    %c0_i32 = arith.constant 0 : i32
    %c0_i32_0 = arith.constant 0 : i32
    %c0_i32_1 = arith.constant 0 : i32
    return %c0_i32, %c0_i32_0 : i32, i32
  }
  func.func @transform_3(%arg0: i32) -> (i32, i32) {
    %c0_i32 = arith.constant 0 : i32
    %c0_i32_0 = arith.constant 0 : i32
    %c0_i32_1 = arith.constant 0 : i32
    return %c0_i32, %c0_i32_0 : i32, i32
  }
  func.func @transform_4(%arg0: i32) -> (i32, i32) {
    %c0_i32 = arith.constant 0 : i32
    %c0_i32_0 = arith.constant 0 : i32
    %c0_i32_1 = arith.constant 0 : i32
    return %c0_i32, %c0_i32_0 : i32, i32
  }
  func.func @transform_5(%arg0: i32) -> (i32, i32) {
    %c0_i32 = arith.constant 0 : i32
    %c0_i32_0 = arith.constant 0 : i32
    %c0_i32_1 = arith.constant 0 : i32
    return %c0_i32, %c0_i32_0 : i32, i32
  }
  func.func @transform_6(%arg0: i32) -> (i32, i32) {
    %c0_i32 = arith.constant 0 : i32
    %c0_i32_0 = arith.constant 0 : i32
    %c0_i32_1 = arith.constant 0 : i32
    return %c0_i32, %c0_i32_0 : i32, i32
  }
  func.func @transform_7(%arg0: i32) -> (i32, i32) {
    %c0_i32 = arith.constant 0 : i32
    %c0_i32_0 = arith.constant 0 : i32
    return %arg0, %c0_i32 : i32, i32
  }
}

</mosaic_0001>

<bundles_post_ra>
// kernel: actor_forward.1
= control target key start
LH: loop header
LB: loop body
LE: loop exit
PB: predicated region body
PF: predicated region fallthrough
CT: control target
= control target key end

     0   :  { %12 = vsyncpa [#allocation3], 0  ;;  %s678_s0 = inlined_call_operand.hbm [shape: f32[8,16], index: 0, kind: input, shape index: {}]   ;;  %s679_s1 = inlined_call_operand.hbm [shape: f32[16,32], index: 1, kind: input, shape index: {}]   ;;  %s680_s2 = inlined_call_operand.vmem [shape: f32[1,32], index: 2, kind: input, shape index: {}]   ;;  %s681_s3 = inlined_call_operand.hbm [shape: f32[32,32], index: 3, kind: input, shape index: {}]   ;;  %s682_s4 = inlined_call_operand.vmem [shape: f32[1,32], index: 4, kind: input, shape index: {}]   ;;  %s683_s5 = inlined_call_operand.hbm [shape: f32[32,128], index: 5, kind: input, shape index: {}]   ;;  %s684_s6 = inlined_call_operand.vmem [shape: f32[1,128], index: 6, kind: input, shape index: {}]   ;;  %s685_s7 = inlined_call_operand.hbm [shape: f32[8,128], index: 7, kind: output, shape index: {}]  }
   0x1   :  { %13 = vsyncpa [#allocation6], 0 }
   0x2   :  { %14 = vsyncpa [#allocation9], 0 }
   0x3   :  { %15 = vsyncpa [#allocation4], 0  ;;  %s547_s24 = smov [#allocation5]   ;;  %s429_s28 = scalar_lea.hbm %s679_s1, 256 }
   0x4   :  { %s31_s25 = sshll.u32 %s547_s24, 4  ;;  %p430_p0 = scmp.ne.s32.totalorder %s679_s1, %s429_s28  ;;  %s32_s25 = int_to_ptr.vmem [resolvable:$true] %s31_s25 }
   0x5   :  { %p433_p1 = scmp.lt.u32.totalorder %s429_s28, %s679_s1 }
   0x7   :  { %p435_p2 = pnand %p433_p1, %p430_p0 }
   0x9   :  { %438 = shalt.err (!%p435_p2)
}
   0xa   :  { %s439_s10 = scalar_lea.vmem %s32_s25, 256  ;;  %p444_p4 = scmp.lt.s32.totalorder %s32_s25, %s32_s25 }
   0xb   :  { %p440_p3 = scmp.ne.s32.totalorder %s32_s25, %s439_s10  ;;  %p445_p5 = scmp.lt.s32.totalorder %s439_s10, %s439_s10 }
   0xd   :  { %p446_p6 = por %p445_p5, %p444_p4 }
   0xf   :  { %p447_p7 = pnand %p446_p6, %p440_p3 }
  0x11   :  { %450 = shalt.err (!%p447_p7)
}
  0x12   :  { %s548_s11 = smov 128   ;;  %s549_s12 = smov 8  }
  0x13   :  { %37 = dma.hbm_to_vmem [thread:$0]  %s679_s1, 256, %s32_s25, [#allocation6], %s548_s11, %s548_s11, %s549_s12  }
  0x14   :  { %s550_s15 = smov [#allocation2]   ;;  %s551_s17 = smov [#allocation7]  }
  0x15   :  { %s22_s16 = sshll.u32 %s550_s15, 4  ;;  %s45_s18 = sshll.u32 %s551_s17, 4  ;;  %s23_s16 = int_to_ptr.vmem [resolvable:$true] %s22_s16  ;;  %s46_s18 = int_to_ptr.vmem [resolvable:$true] %s45_s18 }
  0x16   :  { %s451_s21 = scalar_lea.hbm %s678_s0, 128 }
  0x17   :  { %p452_p8 = scmp.ne.s32.totalorder %s678_s0, %s451_s21  ;;  %p455_p9 = scmp.lt.u32.totalorder %s451_s21, %s678_s0 }
  0x19   :  { %p457_p10 = pnand %p455_p9, %p452_p8 }
  0x1b   :  { %460 = shalt.err (!%p457_p10)
}
  0x1c   :  { %s461_s1 = scalar_lea.vmem %s23_s16, 128  ;;  %p466_p12 = scmp.lt.s32.totalorder %s23_s16, %s23_s16 }
  0x1d   :  { %p462_p11 = scmp.ne.s32.totalorder %s23_s16, %s461_s1  ;;  %p467_p13 = scmp.lt.s32.totalorder %s461_s1, %s461_s1 }
  0x1f   :  { %p468_p0 = por %p467_p13, %p466_p12 }
  0x21   :  { %p469_p1 = pnand %p468_p0, %p462_p11 }
  0x23   :  { %472 = shalt.err (!%p469_p1)
}
  0x24   :  { %25 = dma.hbm_to_vmem [thread:$0]  %s678_s0, 128, %s23_s16, [#allocation3]  }
  0x25   :  { %s473_s30 = scalar_lea.hbm %s681_s3, 512 }
  0x26   :  { %p474_p2 = scmp.ne.s32.totalorder %s681_s3, %s473_s30  ;;  %p477_p3 = scmp.lt.u32.totalorder %s473_s30, %s681_s3 }
  0x28   :  { %p479_p4 = pnand %p477_p3, %p474_p2 }
  0x2a   :  { %482 = shalt.err (!%p479_p4)
}
  0x2b   :  { %s483_s14 = scalar_lea.vmem %s46_s18, 512  ;;  %p488_p6 = scmp.lt.s32.totalorder %s46_s18, %s46_s18 }
  0x2c   :  { %p484_p5 = scmp.ne.s32.totalorder %s46_s18, %s483_s14  ;;  %p489_p7 = scmp.lt.s32.totalorder %s483_s14, %s483_s14 }
  0x2e   :  { %p490_p8 = por %p489_p7, %p488_p6 }
  0x30   :  { %p491_p9 = pnand %p490_p8, %p484_p5 }
  0x32   :  { %494 = shalt.err (!%p491_p9)
}
  0x33   :  { %51 = dma.hbm_to_vmem [thread:$0]  %s681_s3, 512, %s46_s18, [#allocation6], %s548_s11, %s548_s11, %s549_s12  }
  0x34   :  { %s552_s16 = smov [#allocation8]   ;;  %s495_s21 = scalar_lea.hbm %s683_s5, 512 }
  0x35   :  { %s59_s17 = sshll.u32 %s552_s16, 4  ;;  %p496_p10 = scmp.ne.s32.totalorder %s683_s5, %s495_s21  ;;  %s60_s17 = int_to_ptr.vmem [resolvable:$true] %s59_s17 }
  0x36   :  { %p499_p11 = scmp.lt.u32.totalorder %s495_s21, %s683_s5 }
  0x38   :  { %p501_p12 = pnand %p499_p11, %p496_p10 }
  0x3a   :  { %504 = shalt.err (!%p501_p12)
}
  0x3b   :  { %s505_s1 = scalar_lea.vmem %s60_s17, 512  ;;  %p510_p0 = scmp.lt.s32.totalorder %s60_s17, %s60_s17 }
  0x3c   :  { %p506_p13 = scmp.ne.s32.totalorder %s60_s17, %s505_s1  ;;  %p511_p1 = scmp.lt.s32.totalorder %s505_s1, %s505_s1 }
  0x3e   :  { %p512_p2 = por %p511_p1, %p510_p0 }
  0x40   :  { %p513_p3 = pnand %p512_p2, %p506_p13 }
  0x42   :  { %516 = shalt.err (!%p513_p3)
}
  0x43   :  { %65 = dma.hbm_to_vmem [thread:$0]  %s683_s5, 512, %s60_s17, [#allocation9], %s548_s11, %s548_s11, %s549_s12  }
  0x44   :  { %539 = dma.done.wait [#allocation3], 128  }
  0x45   :  { %540 = vsyncadd [#allocation3], 4294967168 }
  0x46   :  { %541 = dma.done.wait [#allocation6], 768  }
  0x47   :  { %542 = vsyncadd [#allocation6], 4294966528 }
  0x48   :  { %543 = dma.done.wait [#allocation9], 512  }
  0x49   :  { %544 = vsyncadd [#allocation9], 4294966784  ;;  %v553_v0 = vmov 0.0|0.0   ;;  %vm554_vm0 = vmmov 0   ;;  %v555_v1 = vmov 0.0   ;;  %v81_v2 = vld [vmem:[#allocation5] sm:$0xff] }
  0x4a   :  { %402 = vmatprep.subr.bf16.mxu0 %v553_v0  ;;  %377 = vmatprep.mubr.msk.f32.mxu0 %vm554_vm0, %v555_v1  ;;  %v82_v3 = vld [vmem:[#allocation5 + $0x8] sm:$0xff]  ;;  %v165_v5 = vld [vmem:[#allocation7] sm:$0xff]  ;;  %v166_v6 = vld [vmem:[#allocation7 + $0x8] sm:$0xff]  ;;  %vm90_vm1 = vcmask 130048   ;;  %vm176_vm2 = vcmask 261120   ;;  %s556_s28 = smov [#allocation10]  }
  0x4b   :  { %405 = vmatprep.subr.bf16.mxu1 %v553_v0  ;;  %388 = vmatprep.mubr.msk.f32.mxu1 %vm554_vm0, %v555_v1  ;;  %v403_v4 = vpack.c.bf16 %v82_v3, %v81_v2  ;;  %v406_v7 = vpack.c.bf16 %v166_v6, %v165_v5  ;;  %v80_v8 = vld [vmem:[#allocation2] sm:$0xff]  ;;  %v167_v9 = vld [vmem:[#allocation7 + $0x10] sm:$0xff]  ;;  %v168_v10 = vld [vmem:[#allocation7 + $0x18] sm:$0xff]  ;;  %s343_s29 = sshll.u32 %s556_s28, 4  ;;  %s344_s29 = int_to_ptr.vmem [resolvable:$true] %s343_s29 }
  0x4c   :  { %v409_v11 = vpack.c.bf16 %v168_v10, %v167_v9  ;;  %v251_v12 = vld [vmem:[#allocation8] sm:$0xff]  ;;  %v252_v13 = vld [vmem:[#allocation8 + $0x8] sm:$0xff]  ;;  %v253_v20 = vld [vmem:[#allocation8 + $0x10] sm:$0xff]  ;;  %s517_s30 = scalar_lea.vmem %s344_s29, 128  ;;  %p522_p5 = scmp.lt.s32.totalorder %s344_s29, %s344_s29 }
  0x4d   :  { %404 = vmatpush3.bf16.msra.mxu0 %v403_v4  ;;  %407 = vmatpush3.bf16.msra.mxu1 %v406_v7  ;;  %v412_v14 = vpack.c.bf16 %v252_v13, %v251_v12  ;;  %v354_v15 = vld [vmem:[%s680_s2] ss:$0 sm:$0xff]  ;;  %v254_v21 = vld [vmem:[#allocation8 + $0x18] sm:$0xff]  ;;  %p518_p4 = scmp.ne.s32.totalorder %s344_s29, %s517_s30  ;;  %p523_p6 = scmp.lt.s32.totalorder %s517_s30, %s517_s30 }
  0x4e   :  { %411 = vmatprep.subr.bf16.mxu0 %v553_v0  ;;  %408 = vmatprep.subr.bf16.mxu1 %v553_v0  ;;  %v415_v22 = vpack.c.bf16 %v254_v21, %v253_v20  ;;  %v356_v23 = vld [vmem:[%s682_s4] ss:$0 sm:$0xff] }
  0x4f   :  { %v358_v28 = vld [vmem:[%s684_s6] ss:$0 sm:$0xff]  ;;  %p524_p7 = por %p523_p6, %p522_p5 }
  0x50   :  { %378 = vmatmul.mubr.msk.f32.vlgmr.msra.gmra.mrb[0].mxu0 %vm90_vm1, %v80_v8 }
  0x51   :  { %399 = vmatprep.mubr.msk.f32.mxu0 %vm554_vm0, %v555_v1  ;;  %410 = vmatpush3.bf16.msra.mxu1 %v409_v11  ;;  %p525_p8 = pnand %p524_p7, %p518_p4 }
  0x52   :  { %413 = vmatpush3.bf16.msra.mxu0 %v412_v14 }
  0x53   :  { %414 = vmatprep.subr.bf16.mxu0 %v553_v0 }
  0x56   :  { %416 = vmatpush3.bf16.msra.mxu0 %v415_v22 }
 0x123   :  { %v160_v16 = vpop.f32.mrb[0].mxu0 }
 0x124   :  { %v161_v17 = vadd.f32 %v354_v15, %v160_v16  ;;  %v379_v18 = vpop.f32.mrb[1].mxu0 }
 0x126   :  { %v164_v19 = vmax.f32 %v161_v17, 0.0 }
 0x128   :  { %389 = vmatmul.mubr.msk.f32.vlgmr.msra.gmra.mrb[0].mxu1 %vm176_vm2, %v164_v19 }
 0x1fb   :  { %v246_v24 = vpop.f32.mrb[0].mxu1 }
 0x1fc   :  { %v247_v25 = vadd.f32 %v356_v23, %v246_v24  ;;  %v390_v26 = vpop.f32.mrb[1].mxu1 }
 0x1fe   :  { %v250_v27 = vmax.f32 %v247_v25, 0.0 }
 0x200   :  { %400 = vmatmul.mubr.msk.f32.vlgmr.msra.gmra.mrb[2].mxu0 %vm176_vm2, %v250_v27 }
 0x2d3   :  { %v331_v29 = vpop.f32.mrb[2].mxu0 }
 0x2d4   :  { %v332_v30 = vadd.f32 %v358_v28, %v331_v29  ;;  %v401_v31 = vpop.f32.mrb[3].mxu0 }
 0x2d6   :  { %427 = vtanh.f32 %v332_v30 }
 0x2e0   :  { %v428_v32 = vpop.eup %427 }
 0x2e1   :  { %336 = vst [vmem:[#allocation10] sm:$0xff] %v428_v32 }
 0x2e2   :  { %528 = shalt.err (!%p525_p8)
}
 0x2e3   :  { %s529_s6 = scalar_lea.hbm %s685_s7, 128 }
 0x2e4   :  { %p530_p9 = scmp.ne.s32.totalorder %s685_s7, %s529_s6  ;;  %p533_p10 = scmp.lt.u32.totalorder %s529_s6, %s685_s7 }
 0x2e6   :  { %p535_p11 = pnand %p533_p10, %p530_p9 }
 0x2e8   :  { %538 = shalt.err (!%p535_p11)
}
 0x2e9   :  { %346 = dma.vmem_to_hbm [thread:$0]  %s344_s29, 128, %s685_s7, [#allocation4]  }
 0x2ea   :  { %545 = dma.done.wait [#allocation4], 128  }
 0x2eb   :  { %546 = vsyncadd [#allocation4], 4294967168 }
 0x2ec   :  { %350 = vsyncpa [#allocation3], 1 }
 0x2ed   :  { %351 = vsyncpa [#allocation6], 1 }
 0x2ee   :  { %352 = vsyncpa [#allocation9], 1 }
 0x2ef   :  { %353 = vsyncpa [#allocation4], 1 }

</bundles_post_ra>
